<compile_context>
chip_gen: v7x
topology: tpu7x:2x2x1
jax: 0.10.0
libtpu: 0.0.40
codegen_flags: <defaults>
</compile_context>

<pallas_src>
import jax
import jax.numpy as jnp
from jax.experimental import pallas as pl
from jax.experimental.pallas import tpu as pltpu

ACTION_DIM = 18
EMBED_DIM = 256
LN_EPS = 1e-5
_MAX_TB = 256  # M-tile cap: fills the 256-wide MXU on v6e/v7x (128 ok on v5e)


def _round_up(x, m):
    return ((x + m - 1) // m) * m


def _encoder_kernel(idx_ref, table_ref, gamma_ref, beta_ref, o_ref):
    # idx_ref:   (TB, 1)     int32   action indices for this batch tile
    # table_ref: (A_pad, D)  f32     fused table  E @ W^T + b  (rows >= 18 unused)
    # gamma_ref: (1, D)      f32     LayerNorm weight
    # beta_ref:  (1, D)      f32     LayerNorm bias
    # o_ref:     (TB, D)     f32     output tile
    tb = idx_ref.shape[0]
    a_pad = table_ref.shape[0]

    # One-hot encode the indices: (TB, A_pad).  Fused-table "gather" as a
    # single small MXU matmul: (TB, A_pad) @ (A_pad, D) -> (TB, D) which is
    # exactly  embedding(x) @ W^T + b.
    iota = jax.lax.broadcasted_iota(jnp.int32, (tb, a_pad), dimension=1)
    onehot = (iota == idx_ref[...]).astype(jnp.float32)
    y = jnp.dot(onehot, table_ref[...], preferred_element_type=jnp.float32)

    # LayerNorm over the last dimension.
    mean = jnp.mean(y, axis=-1, keepdims=True)
    centered = y - mean
    var = jnp.mean(centered * centered, axis=-1, keepdims=True)
    yhat = centered * jax.lax.rsqrt(var + LN_EPS)
    o_ref[...] = yhat * gamma_ref[...] + beta_ref[...]


def fuse_params(emb_table, w_t, b):
    """Fold the Linear layer into the embedding table. Call ONCE per params."""
    return (emb_table @ w_t + b).astype(jnp.float32)  # (A_pad, D)


@jax.jit
def atari_action_encoder(x_idx, efused, gamma, beta):
    """x_idx: (B,) int action indices -> (B, EMBED_DIM) float32."""
    B = x_idx.shape[0]
    a_pad, D = efused.shape

    tb = min(_MAX_TB, _round_up(B, 8))
    b_pad = _round_up(B, tb)

    idx = jnp.clip(x_idx.astype(jnp.int32), 0, ACTION_DIM - 1)
    idx = jnp.pad(idx, (0, b_pad - B)).reshape(b_pad, 1)

    out = pl.pallas_call(
        _encoder_kernel,
        out_shape=jax.ShapeDtypeStruct((b_pad, D), jnp.float32),
        grid=(b_pad // tb,),
        in_specs=[
            pl.BlockSpec((tb, 1), lambda i: (i, 0)),        # indices per tile
            pl.BlockSpec((a_pad, D), lambda i: (0, 0)),      # fused table (resident)
            pl.BlockSpec((1, D), lambda i: (0, 0)),          # gamma (resident)
            pl.BlockSpec((1, D), lambda i: (0, 0)),          # beta  (resident)
        ],
        out_specs=pl.BlockSpec((tb, D), lambda i: (i, 0)),
        compiler_params=pltpu.CompilerParams(
            dimension_semantics=("parallel",),
            vmem_limit_bytes=4 << 20,
        ),
    )(idx, efused, gamma, beta)
    return out[:B]


def init_params(key, action_dim=ACTION_DIM, embedding_dim=EMBED_DIM):
    """Deterministic synthetic parameters matching PyTorch layer shapes/inits."""
    k_emb, k_w, k_b = jax.random.split(key, 3)
    a_pad = _round_up(action_dim, 8)  # pad rows for friendly sublane layout

    # nn.Embedding: N(0, 1); padded rows stay zero (never selected).
    emb = jnp.zeros((a_pad, embedding_dim), jnp.float32)
    emb = emb.at[:action_dim].set(
        jax.random.normal(k_emb, (action_dim, embedding_dim), jnp.float32)
    )

    # nn.Linear(embedding_dim, embedding_dim): U(-1/sqrt(in), 1/sqrt(in)).
    bound = 1.0 / jnp.sqrt(jnp.float32(embedding_dim))
    w = jax.random.uniform(
        k_w, (embedding_dim, embedding_dim), jnp.float32, -bound, bound
    )  # PyTorch layout (out, in)
    w_t = w.T  # (in, out)
    b = jax.random.uniform(k_b, (1, embedding_dim), jnp.float32, -bound, bound)

    # nn.LayerNorm: weight=1, bias=0
    gamma = jnp.ones((1, embedding_dim), jnp.float32)
    beta = jnp.zeros((1, embedding_dim), jnp.float32)
    return emb, w_t, b, gamma, beta


def _reference(x_idx, emb_table, w_t, b, gamma, beta):
    e = emb_table[x_idx]
    y = e @ w_t + b
    mean = y.mean(-1, keepdims=True)
    var = ((y - mean) ** 2).mean(-1, keepdims=True)
    return (y - mean) / jnp.sqrt(var + LN_EPS) * gamma + beta


if __name__ == "__main__":
    key = jax.random.PRNGKey(0)
    k_params, k_idx = jax.random.split(key)

    emb, w_t, b, gamma, beta = init_params(k_params)
    efused = fuse_params(emb, w_t, b)  # one-time param fusion, outside the hot path

    batch = 8
    x_idx = jax.random.randint(k_idx, (batch,), 0, ACTION_DIM, dtype=jnp.int32)

    out = atari_action_encoder(x_idx, efused, gamma, beta)
    out = jax.block_until_ready(out)

    ref = _reference(x_idx, emb, w_t, b, gamma, beta)
    assert out.shape == (batch, EMBED_DIM), out.shape
    assert jnp.allclose(out, ref, atol=1e-4, rtol=1e-4), "mismatch vs reference"
    print("KERNEL_OK")
</pallas_src>

<mosaic_0001>
module attributes {stable_mosaic.version = 11 : i64} {
  func.func @_encoder_kernel(%arg0: i32, %arg1: memref<8x1xi32, #tpu.memory_space<vmem>>, %arg2: memref<24x256xf32, #tpu.memory_space<vmem>>, %arg3: memref<1x256xf32, #tpu.memory_space<vmem>>, %arg4: memref<1x256xf32, #tpu.memory_space<vmem>>, %arg5: memref<8x256xf32, #tpu.memory_space<vmem>>) attributes {dimension_semantics = [#tpu.dimension_semantics<parallel>], iteration_bounds = array<i64: 1>, scalar_prefetch = 0 : i64, scratch_operands = 0 : i64, tpu.core_type = #tpu.core_type<tc>, window_params = [{transform_indices = @transform_0, window_bounds = array<i64: 8, 1>}, {pipeline_mode = #tpu.pipeline_mode<synchronous>, transform_indices = @transform_1, window_bounds = array<i64: 24, 256>}, {pipeline_mode = #tpu.pipeline_mode<synchronous>, transform_indices = @transform_2, window_bounds = array<i64: 1, 256>}, {pipeline_mode = #tpu.pipeline_mode<synchronous>, transform_indices = @transform_3, window_bounds = array<i64: 1, 256>}, {transform_indices = @transform_4, window_bounds = array<i64: 8, 256>}]} {
    %0 = tpu.iota {dimensions = array<i32: 1>} : vector<8x24xi32>
    %c0 = arith.constant 0 : index
    %c0_0 = arith.constant 0 : index
    %1 = vector.load %arg1[%c0, %c0_0] : memref<8x1xi32, #tpu.memory_space<vmem>>, vector<8x1xi32>
    %2 = vector.broadcast %1 : vector<8x1xi32> to vector<8x24xi32>
    %3 = arith.cmpi eq, %0, %2 : vector<8x24xi32>
    %4 = arith.extui %3 : vector<8x24xi1> to vector<8x24xi32>
    %5 = arith.sitofp %4 : vector<8x24xi32> to vector<8x24xf32>
    %c0_1 = arith.constant 0 : index
    %c0_2 = arith.constant 0 : index
    %6 = vector.load %arg2[%c0_1, %c0_2] : memref<24x256xf32, #tpu.memory_space<vmem>>, vector<24x256xf32>
    %cst = arith.constant dense<0.000000e+00> : vector<8x256xf32>
    %7 = tpu.matmul %5, %6, %cst {dimension_numbers = #tpu.dot_dimension_numbers<[1], [0], [0], [1], [0, 0, 1, 1], [], []>} : vector<8x24xf32>, vector<24x256xf32>, vector<8x256xf32> -> vector<8x256xf32>
    %cst_3 = arith.constant dense<0.000000e+00> : vector<8xf32>
    %8 = vector.multi_reduction <add>, %7, %cst_3 [1] : vector<8x256xf32> to vector<8xf32>
    %9 = vector.shape_cast %8 : vector<8xf32> to vector<8x1xf32>
    %cst_4 = arith.constant 2.560000e+02 : f32
    %10 = vector.broadcast %cst_4 : f32 to vector<8x1xf32>
    %11 = arith.divf %9, %10 : vector<8x1xf32>
    %12 = vector.broadcast %11 : vector<8x1xf32> to vector<8x256xf32>
    %13 = arith.subf %7, %12 : vector<8x256xf32>
    %14 = arith.mulf %13, %13 : vector<8x256xf32>
    %cst_5 = arith.constant dense<0.000000e+00> : vector<8xf32>
    %15 = vector.multi_reduction <add>, %14, %cst_5 [1] : vector<8x256xf32> to vector<8xf32>
    %16 = vector.shape_cast %15 : vector<8xf32> to vector<8x1xf32>
    %cst_6 = arith.constant 2.560000e+02 : f32
    %17 = vector.broadcast %cst_6 : f32 to vector<8x1xf32>
    %18 = arith.divf %16, %17 : vector<8x1xf32>
    %cst_7 = arith.constant 9.99999974E-6 : f32
    %19 = vector.broadcast %cst_7 : f32 to vector<8x1xf32>
    %20 = arith.addf %18, %19 : vector<8x1xf32>
    %21 = math.rsqrt %20 : vector<8x1xf32>
    %22 = vector.broadcast %21 : vector<8x1xf32> to vector<8x256xf32>
    %23 = arith.mulf %13, %22 : vector<8x256xf32>
    %c0_8 = arith.constant 0 : index
    %c0_9 = arith.constant 0 : index
    %24 = vector.load %arg3[%c0_8, %c0_9] : memref<1x256xf32, #tpu.memory_space<vmem>>, vector<1x256xf32>
    %25 = vector.broadcast %24 : vector<1x256xf32> to vector<8x256xf32>
    %26 = arith.mulf %23, %25 : vector<8x256xf32>
    %c0_10 = arith.constant 0 : index
    %c0_11 = arith.constant 0 : index
    %27 = vector.load %arg4[%c0_10, %c0_11] : memref<1x256xf32, #tpu.memory_space<vmem>>, vector<1x256xf32>
    %28 = vector.broadcast %27 : vector<1x256xf32> to vector<8x256xf32>
    %29 = arith.addf %26, %28 : vector<8x256xf32>
    %c0_12 = arith.constant 0 : index
    %c0_13 = arith.constant 0 : index
    %30 = vector.load %arg5[%c0_12, %c0_13] : memref<8x256xf32, #tpu.memory_space<vmem>>, vector<8x256xf32>
    tpu.vector_store %arg5[%c0_12, %c0_13], %29 {strides = array<i32>} : memref<8x256xf32, #tpu.memory_space<vmem>>, vector<8x256xf32>,
    return
  }
  func.func @transform_0(%arg0: i32) -> (i32, i32) {
    %c0_i32 = arith.constant 0 : i32
    %c0_i32_0 = arith.constant 0 : i32
    return %arg0, %c0_i32 : i32, i32
  }
  func.func @transform_1(%arg0: i32) -> (i32, i32) {
    %c0_i32 = arith.constant 0 : i32
    %c0_i32_0 = arith.constant 0 : i32
    %c0_i32_1 = arith.constant 0 : i32
    return %c0_i32, %c0_i32_0 : i32, i32
  }
  func.func @transform_2(%arg0: i32) -> (i32, i32) {
    %c0_i32 = arith.constant 0 : i32
    %c0_i32_0 = arith.constant 0 : i32
    %c0_i32_1 = arith.constant 0 : i32
    return %c0_i32, %c0_i32_0 : i32, i32
  }
  func.func @transform_3(%arg0: i32) -> (i32, i32) {
    %c0_i32 = arith.constant 0 : i32
    %c0_i32_0 = arith.constant 0 : i32
    %c0_i32_1 = arith.constant 0 : i32
    return %c0_i32, %c0_i32_0 : i32, i32
  }
  func.func @transform_4(%arg0: i32) -> (i32, i32) {
    %c0_i32 = arith.constant 0 : i32
    %c0_i32_0 = arith.constant 0 : i32
    return %arg0, %c0_i32 : i32, i32
  }
}

</mosaic_0001>

<bundles_post_ra>
// kernel: atari_action_encoder.1
= control target key start
LH: loop header
LB: loop body
LE: loop exit
PB: predicated region body
PF: predicated region fallthrough
CT: control target
= control target key end

     0   :  { %9 = vsyncpa [#allocation3], 0  ;;  %s311_s0 = inlined_call_operand.vmem [shape: s32[8,1], index: 0, kind: input, shape index: {}]   ;;  %s312_s1 = inlined_call_operand.hbm [shape: f32[24,256], index: 1, kind: input, shape index: {}]   ;;  %s313_s2 = inlined_call_operand.vmem [shape: f32[1,256], index: 2, kind: input, shape index: {}]   ;;  %s314_s3 = inlined_call_operand.vmem [shape: f32[1,256], index: 3, kind: input, shape index: {}]   ;;  %s315_s4 = inlined_call_operand.hbm [shape: f32[8,256], index: 4, kind: output, shape index: {}]  }
   0x1   :  { %10 = vsyncpa [#allocation4], 0  ;;  %s247_s15 = smov [#allocation2]   ;;  %s199_s19 = scalar_lea.hbm %s312_s1, 768 }
   0x2   :  { %s18_s16 = sshll.u32 %s247_s15, 4  ;;  %p200_p0 = scmp.ne.s32.totalorder %s312_s1, %s199_s19  ;;  %s19_s16 = int_to_ptr.vmem [resolvable:$true] %s18_s16 }
   0x3   :  { %p203_p1 = scmp.lt.u32.totalorder %s199_s19, %s312_s1 }
   0x5   :  { %p205_p2 = pnand %p203_p1, %p200_p0 }
   0x7   :  { %208 = shalt.err (!%p205_p2)
}
   0x8   :  { %s209_s24 = scalar_lea.vmem %s19_s16, 768  ;;  %p214_p4 = scmp.lt.s32.totalorder %s19_s16, %s19_s16 }
   0x9   :  { %p210_p3 = scmp.ne.s32.totalorder %s19_s16, %s209_s24  ;;  %p215_p5 = scmp.lt.s32.totalorder %s209_s24, %s209_s24 }
   0xb   :  { %p216_p6 = por %p215_p5, %p214_p4 }
   0xd   :  { %p217_p7 = pnand %p216_p6, %p210_p3 }
   0xf   :  { %220 = shalt.err (!%p217_p7)
}
  0x10   :  { %s248_s25 = smov 256   ;;  %s249_s26 = smov 16  }
  0x11   :  { %24 = dma.hbm_to_vmem [thread:$0]  %s312_s1, 768, %s19_s16, [#allocation3], %s248_s25, %s248_s25, %s249_s26  }
  0x12   :  { %243 = dma.done.wait [#allocation3], 768  }
  0x13   :  { %244 = vsyncadd [#allocation3], 4294966528  ;;  %v250_v0 = vmov 0   ;;  %v34_v1 = vld [vmem:[%s311_s0] sm:$0xff]  ;;  %v42_v2 = vld [vmem:[#allocation2 + $0x8] sm:$0xff]  ;;  %v251_v9 = vmov 0.0   ;;  %v32_v11 = vlaneseq }
  0x14   :  { %196 = vset.pattern.permute.xlu0 %v250_v0  ;;  %v44_v3 = vld [vmem:[#allocation2 + $0x18] sm:$0xff]  ;;  %v41_v5 = vld [vmem:[#allocation2] sm:$0xff]  ;;  %v43_v6 = vld [vmem:[#allocation2 + $0x10] sm:$0xff]  ;;  %115 = vmatprep.mubr.f32.mxu0 %v251_v9  ;;  %vm47_vm0 = vcmask 195584   ;;  %s252_s7 = smov [#allocation5]  }
  0x15   :  { %36 = vperm.xlu0 %196, %v34_v1   ;;  %v186_v4 = vpack.c.bf16 %v44_v3, %v42_v2  ;;  %v188_v7 = vpack.c.bf16 %v43_v6, %v41_v5  ;;  %v46_v8 = vld [vmem:[#allocation2 + $0x28] sm:$0xff]  ;;  %v45_v10 = vld [vmem:[#allocation2 + $0x20] sm:$0xff]  ;;  %v33_v12 = vand.u32 127, %v32_v11  ;;  %v142_v28 = vshrl.u32 %v32_v11, 7  ;;  %s175_s8 = sshll.u32 %s252_s7, 4  ;;  %s176_s8 = int_to_ptr.vmem [resolvable:$true] %s175_s8 }
  0x16   :  { %v139_v31 = vld [vmem:[%s313_s2] sm:$0x3]  ;;  %s221_s2 = scalar_lea.vmem %s176_s8, 256  ;;  %p226_p9 = scmp.lt.s32.totalorder %s176_s8, %s176_s8 }
  0x17   :  { %187 = vmatprep.subr.bf16.mxu0 %v186_v4  ;;  %v143_v29 = vsub.s32 0, %v142_v28  ;;  %v147_v30 = vsub.s32 1, %v142_v28  ;;  %v153_v32 = vld [vmem:[%s314_s3] sm:$0x3]  ;;  %p222_p8 = scmp.ne.s32.totalorder %s176_s8, %s221_s2  ;;  %p227_p10 = scmp.lt.s32.totalorder %s221_s2, %s221_s2 }
  0x18   :  { %189 = vmatpush1.bf16.msra.mxu0 %v188_v7 }
  0x19   :  { %55 = vmatprep.subr.mxu0 %v46_v8  ;;  %v144_v33 = vrot.slane %v139_v31, %v143_v29  ;;  %v148_v34 = vrot.slane %v139_v31, %v147_v30  ;;  %v158_v38 = vrot.slane %v153_v32, %v143_v29  ;;  %v162_v39 = vrot.slane %v153_v32, %v147_v30  ;;  %p228_p11 = por %p227_p10, %p226_p9 }
  0x1b   :  { %p229_p12 = pnand %p228_p11, %p222_p8 }
  0x1c   :  { %56 = vmatpush1.msra.mxu0 %v45_v10 }
  0x94   :  { %v37_v13 = vpop.permute.xlu0 %36 }
  0x95   :  { %vm38_vm1 = vcmp.eq.s32.totalorder %v33_v12, %v37_v13 }
  0x96   :  { %v184_v14 = vsel %vm38_vm1, 1.0, %v251_v9 }
  0x97   :  { %185 = vmatmul.mubr.msk.f32.vlgmr.msra.gmra.mrb[0].mxu0 %vm47_vm0, %v184_v14 }
 0x16a   :  { %v117_v15 = vpop.f32.mrb[0].mxu0 }
 0x16b   :  { %v119_v16 = vpop.f32.mrb[1].mxu0 }
 0x16c   :  { %v122_v17 = vadd.f32 %v119_v16, %v117_v15 }
 0x16e   :  { %123 = vadd.xlane.f32.xlu0 %v122_v17 }
 0x1fb   :  { %v124_v18 = vpop.xlane.xlu0 %123 }
 0x1fc   :  { %v126_v19 = vmul.f32 0.00390625, %v124_v18 }
 0x1fe   :  { %v127_v20 = vsub.f32 %v117_v15, %v126_v19  ;;  %v128_v21 = vsub.f32 %v119_v16, %v126_v19 }
 0x200   :  { %v129_v22 = vmul.f32 %v127_v20, %v127_v20  ;;  %v130_v23 = vmul.f32 %v128_v21, %v128_v21 }
 0x202   :  { %v131_v24 = vadd.f32 %v130_v23, %v129_v22 }
 0x204   :  { %132 = vadd.xlane.f32.xlu1 %v131_v24 }
 0x291   :  { %v133_v25 = vpop.xlane.xlu1 %132 }
 0x292   :  { %v134_v26 = vmul.f32 0.00390625, %v133_v25 }
 0x294   :  { %v135_v27 = vadd.f32 1e-05, %v134_v26 }
 0x296   :  { %197 = vrsqrt.f32 %v135_v27 }
 0x2a0   :  { %v198_v35 = vpop.eup %197 }
 0x2a1   :  { %v137_v36 = vmul.f32 %v198_v35, %v127_v20  ;;  %v138_v37 = vmul.f32 %v198_v35, %v128_v21 }
 0x2a3   :  { %v151_v40 = vmul.f32 %v144_v33, %v137_v36  ;;  %v152_v41 = vmul.f32 %v148_v34, %v138_v37 }
 0x2a5   :  { %v165_v42 = vadd.f32 %v158_v38, %v151_v40  ;;  %v166_v43 = vadd.f32 %v162_v39, %v152_v41 }
 0x2a7   :  { %167 = vst [vmem:[#allocation5] sm:$0xff] %v165_v42  ;;  %168 = vst [vmem:[#allocation5 + $0x8] sm:$0xff] %v166_v43 }
 0x2a8   :  { %232 = shalt.err (!%p229_p12)
}
 0x2a9   :  { %s233_s10 = scalar_lea.hbm %s315_s4, 256 }
 0x2aa   :  { %p234_p13 = scmp.ne.s32.totalorder %s315_s4, %s233_s10  ;;  %p237_p0 = scmp.lt.u32.totalorder %s233_s10, %s315_s4 }
 0x2ac   :  { %p239_p1 = pnand %p237_p0, %p234_p13 }
 0x2ae   :  { %242 = shalt.err (!%p239_p1)
}
 0x2af   :  { %178 = dma.vmem_to_hbm [thread:$0]  %s176_s8, 256, %s315_s4, [#allocation4]  }
 0x2b0   :  { %245 = dma.done.wait [#allocation4], 256  }
 0x2b1   :  { %246 = vsyncadd [#allocation4], 4294967040 }
 0x2b2   :  { %182 = vsyncpa [#allocation3], 1 }
 0x2b3   :  { %183 = vsyncpa [#allocation4], 1 }

</bundles_post_ra>
